<compile_context>
chip_gen: v7x
topology: tpu7x:2x2x1
jax: 0.10.0
libtpu: 0.0.40
codegen_flags: <defaults>
</compile_context>

<pallas_src>
import jax
import jax.numpy as jnp
from jax.experimental import pallas as pl
from jax.experimental.pallas import tpu as pltpu

_LANE = 128
_BF16_TILE = 16          # bf16 packs 16 rows per sublane group
_NEG_LARGE = -1e30       # finite stand-in for -inf on padded class lanes


def _round_up(n, m):
    return (n + m - 1) // m * m


# ----------------------------------------------------------------------------
# Kernel: one (TM, 64) batch tile -> (TM, C) log-probs, everything in VMEM.
# ----------------------------------------------------------------------------
def mlp_kernel(x_ref,
               w1_ref, b1_ref, w2_ref, b2_ref, w3_ref, b3_ref,
               w4_ref, b4_ref, w5_ref, b5_ref, w6_ref, b6_ref,
               out_ref):
    def dense(h, w_ref, b_ref):
        # bf16 operands on the MXU, f32 accumulation; bias add in f32.
        z = jnp.dot(h, w_ref[...], preferred_element_type=jnp.float32)
        return z + b_ref[...]

    h = x_ref[...]                                               # (TM, 64) bf16
    h = jnp.maximum(dense(h, w1_ref, b1_ref), 0.0).astype(jnp.bfloat16)  # 128
    h = jnp.maximum(dense(h, w2_ref, b2_ref), 0.0).astype(jnp.bfloat16)  # 256
    h = jnp.maximum(dense(h, w3_ref, b3_ref), 0.0).astype(jnp.bfloat16)  # 512
    h = jnp.maximum(dense(h, w4_ref, b4_ref), 0.0).astype(jnp.bfloat16)  # 256
    h = jnp.maximum(dense(h, w5_ref, b5_ref), 0.0).astype(jnp.bfloat16)  # 128

    # final linear (no ReLU); padded class lanes carry ~-1e30 bias
    logits = dense(h, w6_ref, b6_ref)                            # (TM, C) f32

    # numerically stable log_softmax over the lane-dense class axis.
    # exp(-1e30 - m) == 0, so padded lanes never perturb the normalization.
    m = jnp.max(logits, axis=1, keepdims=True)
    shifted = logits - m
    lse = jnp.log(jnp.sum(jnp.exp(shifted), axis=1, keepdims=True))
    out_ref[...] = shifted - lse


# ----------------------------------------------------------------------------
# One-time parameter preparation: cast to bf16 / f32 and bake the class pad in.
# ----------------------------------------------------------------------------
def prepare_params(params, num_classes):
    C = _round_up(max(num_classes, _LANE), _LANE)     # 10 -> 128 lane-dense

    bf16 = lambda w: jnp.asarray(w, jnp.bfloat16)
    f32 = lambda b: jnp.asarray(b, jnp.float32).reshape(1, -1)

    w6 = jnp.zeros((128, C), jnp.bfloat16).at[:, :num_classes].set(bf16(params["w6"]))
    b6 = jnp.full((1, C), _NEG_LARGE, jnp.float32).at[:, :num_classes].set(
        f32(params["b6"]))

    return (
        bf16(params["w1"]), f32(params["b1"]),
        bf16(params["w2"]), f32(params["b2"]),
        bf16(params["w3"]), f32(params["b3"]),
        bf16(params["w4"]), f32(params["b4"]),
        bf16(params["w5"]), f32(params["b5"]),
        w6, b6,
    )


# ----------------------------------------------------------------------------
# Wrapper: batch tiling + pallas_call.  weight_args comes from prepare_params.
# ----------------------------------------------------------------------------
def net_forward(x, weight_args, num_classes, *, tm=None):
    x = jnp.asarray(x)
    B, in_features = x.shape
    C = weight_args[-1].shape[-1]                     # padded class dim

    # --- batch tile selection ------------------------------------------------
    if tm is None:
        if B <= 256:
            tm = _round_up(B, _BF16_TILE)                     # single tile
        elif B <= 512:
            # two tiles so v7x's second TensorCore gets work
            tm = _round_up(_round_up(B, 2 * _BF16_TILE) // 2, _BF16_TILE)
        else:
            # big tiles amortize per-step overhead & weight re-push,
            # keep >= 2 grid steps for megacore, cap at 1024 rows
            tm = min(1024, _round_up(pl.cdiv(B, 2), 256))
    B_pad = _round_up(B, tm)

    # x travels as bf16; only materialize a padded copy on the ragged path.
    x_bf = x.astype(jnp.bfloat16)
    if B_pad != B:
        x_bf = jnp.zeros((B_pad, in_features), jnp.bfloat16).at[:B].set(x_bf)

    grid = (B_pad // tm,)
    x_spec = pl.BlockSpec((tm, in_features), lambda i: (i, 0))
    out_spec = pl.BlockSpec((tm, C), lambda i: (i, 0))
    # Same block index every grid step => weights/biases stay VMEM-resident.
    pinned_specs = [pl.BlockSpec(a.shape, lambda i: (0, 0)) for a in weight_args]

    out_full = pl.pallas_call(
        mlp_kernel,
        out_shape=jax.ShapeDtypeStruct((B_pad, C), jnp.float32),
        grid=grid,
        in_specs=[x_spec] + pinned_specs,
        out_specs=out_spec,
        compiler_params=pltpu.CompilerParams(
            dimension_semantics=("parallel",),        # megacore sharding on v7x
            vmem_limit_bytes=32 * 1024 * 1024),
    )(x_bf, *weight_args)

    return out_full[:B, :num_classes]


# ----------------------------------------------------------------------------
# Deterministic init mimicking nn.Linear's U(-1/sqrt(fan_in), +1/sqrt(fan_in)),
# with weights stored transposed vs. PyTorch, i.e. (in, out).
# ----------------------------------------------------------------------------
def init_params(key, input_size, num_classes):
    dims = [input_size, 128, 256, 512, 256, 128, num_classes]
    params = {}
    for i in range(6):
        fan_in, fan_out = dims[i], dims[i + 1]
        key, kw, kb = jax.random.split(key, 3)
        bound = 1.0 / jnp.sqrt(fan_in)
        params[f"w{i+1}"] = jax.random.uniform(
            kw, (fan_in, fan_out), jnp.float32, minval=-bound, maxval=bound)
        params[f"b{i+1}"] = jax.random.uniform(
            kb, (1, fan_out), jnp.float32, minval=-bound, maxval=bound)
    return params


def reference_forward(x, params):
    h = x.astype(jnp.float32)
    for i in range(1, 6):
        h = jnp.maximum(h @ params[f"w{i}"] + params[f"b{i}"], 0.0)
    logits = h @ params["w6"] + params["b6"]
    return jax.nn.log_softmax(logits, axis=1)


if __name__ == "__main__":
    input_size = 64
    num_classes = 10

    key = jax.random.PRNGKey(0)
    key, kx1, kx2 = jax.random.split(key, 3)
    params = init_params(key, input_size, num_classes)
    weight_args = prepare_params(params, num_classes)   # cast/pad ONCE

    # 1) small-batch / single-tile path (B=8 -> one 16-row tile)
    x1 = jax.random.normal(kx1, (8, input_size), jnp.float32)
    out1 = jax.block_until_ready(net_forward(x1, weight_args, num_classes))
    ref1 = reference_forward(x1, params)
    assert out1.shape == (8, num_classes)
    # bf16 matmul operands => relaxed tolerance vs the f32 reference.
    assert jnp.allclose(out1, ref1, atol=5e-2, rtol=5e-2), "mismatch (B=8)"

    # 2) multi-step grid + ragged batch-pad path (B=40, tm=16 -> 3 grid steps)
    x2 = jax.random.normal(kx2, (40, input_size), jnp.float32)
    out2 = jax.block_until_ready(net_forward(x2, weight_args, num_classes, tm=16))
    ref2 = reference_forward(x2, params)
    assert out2.shape == (40, num_classes)
    assert jnp.allclose(out2, ref2, atol=5e-2, rtol=5e-2), "mismatch (B=40)"

    print("KERNEL_OK")
</pallas_src>

<mosaic_0001>
module attributes {stable_mosaic.version = 11 : i64} {
  func.func @mlp_kernel(%arg0: i32, %arg1: memref<16x64xbf16, #tpu.memory_space<vmem>>, %arg2: memref<64x128xbf16, #tpu.memory_space<vmem>>, %arg3: memref<1x128xf32, #tpu.memory_space<vmem>>, %arg4: memref<128x256xbf16, #tpu.memory_space<vmem>>, %arg5: memref<1x256xf32, #tpu.memory_space<vmem>>, %arg6: memref<256x512xbf16, #tpu.memory_space<vmem>>, %arg7: memref<1x512xf32, #tpu.memory_space<vmem>>, %arg8: memref<512x256xbf16, #tpu.memory_space<vmem>>, %arg9: memref<1x256xf32, #tpu.memory_space<vmem>>, %arg10: memref<256x128xbf16, #tpu.memory_space<vmem>>, %arg11: memref<1x128xf32, #tpu.memory_space<vmem>>, %arg12: memref<128x128xbf16, #tpu.memory_space<vmem>>, %arg13: memref<1x128xf32, #tpu.memory_space<vmem>>, %arg14: memref<16x128xf32, #tpu.memory_space<vmem>>) attributes {dimension_semantics = [#tpu.dimension_semantics<parallel>], iteration_bounds = array<i64: 1>, scalar_prefetch = 0 : i64, scratch_operands = 0 : i64, tpu.core_type = #tpu.core_type<tc>, window_params = [{transform_indices = @transform_0, window_bounds = array<i64: 16, 64>}, {pipeline_mode = #tpu.pipeline_mode<synchronous>, transform_indices = @transform_1, window_bounds = array<i64: 64, 128>}, {pipeline_mode = #tpu.pipeline_mode<synchronous>, transform_indices = @transform_2, window_bounds = array<i64: 1, 128>}, {pipeline_mode = #tpu.pipeline_mode<synchronous>, transform_indices = @transform_3, window_bounds = array<i64: 128, 256>}, {pipeline_mode = #tpu.pipeline_mode<synchronous>, transform_indices = @transform_4, window_bounds = array<i64: 1, 256>}, {pipeline_mode = #tpu.pipeline_mode<synchronous>, transform_indices = @transform_5, window_bounds = array<i64: 256, 512>}, {pipeline_mode = #tpu.pipeline_mode<synchronous>, transform_indices = @transform_6, window_bounds = array<i64: 1, 512>}, {pipeline_mode = #tpu.pipeline_mode<synchronous>, transform_indices = @transform_7, window_bounds = array<i64: 512, 256>}, {pipeline_mode = #tpu.pipeline_mode<synchronous>, transform_indices = @transform_8, window_bounds = array<i64: 1, 256>}, {pipeline_mode = #tpu.pipeline_mode<synchronous>, transform_indices = @transform_9, window_bounds = array<i64: 256, 128>}, {pipeline_mode = #tpu.pipeline_mode<synchronous>, transform_indices = @transform_10, window_bounds = array<i64: 1, 128>}, {pipeline_mode = #tpu.pipeline_mode<synchronous>, transform_indices = @transform_11, window_bounds = array<i64: 128, 128>}, {pipeline_mode = #tpu.pipeline_mode<synchronous>, transform_indices = @transform_12, window_bounds = array<i64: 1, 128>}, {transform_indices = @transform_13, window_bounds = array<i64: 16, 128>}]} {
    %c0 = arith.constant 0 : index
    %c0_0 = arith.constant 0 : index
    %0 = vector.load %arg1[%c0, %c0_0] : memref<16x64xbf16, #tpu.memory_space<vmem>>, vector<16x64xbf16>
    %c0_1 = arith.constant 0 : index
    %c0_2 = arith.constant 0 : index
    %1 = vector.load %arg2[%c0_1, %c0_2] : memref<64x128xbf16, #tpu.memory_space<vmem>>, vector<64x128xbf16>
    %cst = arith.constant dense<0.000000e+00> : vector<16x128xf32>
    %2 = tpu.matmul %0, %1, %cst {dimension_numbers = #tpu.dot_dimension_numbers<[1], [0], [0], [1], [0, 0, 1, 1], [], []>} : vector<16x64xbf16>, vector<64x128xbf16>, vector<16x128xf32> -> vector<16x128xf32>
    %c0_3 = arith.constant 0 : index
    %c0_4 = arith.constant 0 : index
    %3 = vector.load %arg3[%c0_3, %c0_4] : memref<1x128xf32, #tpu.memory_space<vmem>>, vector<1x128xf32>
    %4 = vector.broadcast %3 : vector<1x128xf32> to vector<16x128xf32>
    %5 = arith.addf %2, %4 : vector<16x128xf32>
    %cst_5 = arith.constant 0.000000e+00 : f32
    %6 = vector.broadcast %cst_5 : f32 to vector<16x128xf32>
    %7 = arith.maximumf %5, %6 : vector<16x128xf32>
    %8 = arith.truncf %7 : vector<16x128xf32> to vector<16x128xbf16>
    %c0_6 = arith.constant 0 : index
    %c0_7 = arith.constant 0 : index
    %9 = vector.load %arg4[%c0_6, %c0_7] : memref<128x256xbf16, #tpu.memory_space<vmem>>, vector<128x256xbf16>
    %cst_8 = arith.constant dense<0.000000e+00> : vector<16x256xf32>
    %10 = tpu.matmul %8, %9, %cst_8 {dimension_numbers = #tpu.dot_dimension_numbers<[1], [0], [0], [1], [0, 0, 1, 1], [], []>} : vector<16x128xbf16>, vector<128x256xbf16>, vector<16x256xf32> -> vector<16x256xf32>
    %c0_9 = arith.constant 0 : index
    %c0_10 = arith.constant 0 : index
    %11 = vector.load %arg5[%c0_9, %c0_10] : memref<1x256xf32, #tpu.memory_space<vmem>>, vector<1x256xf32>
    %12 = vector.broadcast %11 : vector<1x256xf32> to vector<16x256xf32>
    %13 = arith.addf %10, %12 : vector<16x256xf32>
    %cst_11 = arith.constant 0.000000e+00 : f32
    %14 = vector.broadcast %cst_11 : f32 to vector<16x256xf32>
    %15 = arith.maximumf %13, %14 : vector<16x256xf32>
    %16 = arith.truncf %15 : vector<16x256xf32> to vector<16x256xbf16>
    %c0_12 = arith.constant 0 : index
    %c0_13 = arith.constant 0 : index
    %17 = vector.load %arg6[%c0_12, %c0_13] : memref<256x512xbf16, #tpu.memory_space<vmem>>, vector<256x512xbf16>
    %cst_14 = arith.constant dense<0.000000e+00> : vector<16x512xf32>
    %18 = tpu.matmul %16, %17, %cst_14 {dimension_numbers = #tpu.dot_dimension_numbers<[1], [0], [0], [1], [0, 0, 1, 1], [], []>} : vector<16x256xbf16>, vector<256x512xbf16>, vector<16x512xf32> -> vector<16x512xf32>
    %c0_15 = arith.constant 0 : index
    %c0_16 = arith.constant 0 : index
    %19 = vector.load %arg7[%c0_15, %c0_16] : memref<1x512xf32, #tpu.memory_space<vmem>>, vector<1x512xf32>
    %20 = vector.broadcast %19 : vector<1x512xf32> to vector<16x512xf32>
    %21 = arith.addf %18, %20 : vector<16x512xf32>
    %cst_17 = arith.constant 0.000000e+00 : f32
    %22 = vector.broadcast %cst_17 : f32 to vector<16x512xf32>
    %23 = arith.maximumf %21, %22 : vector<16x512xf32>
    %24 = arith.truncf %23 : vector<16x512xf32> to vector<16x512xbf16>
    %c0_18 = arith.constant 0 : index
    %c0_19 = arith.constant 0 : index
    %25 = vector.load %arg8[%c0_18, %c0_19] : memref<512x256xbf16, #tpu.memory_space<vmem>>, vector<512x256xbf16>
    %cst_20 = arith.constant dense<0.000000e+00> : vector<16x256xf32>
    %26 = tpu.matmul %24, %25, %cst_20 {dimension_numbers = #tpu.dot_dimension_numbers<[1], [0], [0], [1], [0, 0, 1, 1], [], []>} : vector<16x512xbf16>, vector<512x256xbf16>, vector<16x256xf32> -> vector<16x256xf32>
    %c0_21 = arith.constant 0 : index
    %c0_22 = arith.constant 0 : index
    %27 = vector.load %arg9[%c0_21, %c0_22] : memref<1x256xf32, #tpu.memory_space<vmem>>, vector<1x256xf32>
    %28 = vector.broadcast %27 : vector<1x256xf32> to vector<16x256xf32>
    %29 = arith.addf %26, %28 : vector<16x256xf32>
    %cst_23 = arith.constant 0.000000e+00 : f32
    %30 = vector.broadcast %cst_23 : f32 to vector<16x256xf32>
    %31 = arith.maximumf %29, %30 : vector<16x256xf32>
    %32 = arith.truncf %31 : vector<16x256xf32> to vector<16x256xbf16>
    %c0_24 = arith.constant 0 : index
    %c0_25 = arith.constant 0 : index
    %33 = vector.load %arg10[%c0_24, %c0_25] : memref<256x128xbf16, #tpu.memory_space<vmem>>, vector<256x128xbf16>
    %cst_26 = arith.constant dense<0.000000e+00> : vector<16x128xf32>
    %34 = tpu.matmul %32, %33, %cst_26 {dimension_numbers = #tpu.dot_dimension_numbers<[1], [0], [0], [1], [0, 0, 1, 1], [], []>} : vector<16x256xbf16>, vector<256x128xbf16>, vector<16x128xf32> -> vector<16x128xf32>
    %c0_27 = arith.constant 0 : index
    %c0_28 = arith.constant 0 : index
    %35 = vector.load %arg11[%c0_27, %c0_28] : memref<1x128xf32, #tpu.memory_space<vmem>>, vector<1x128xf32>
    %36 = vector.broadcast %35 : vector<1x128xf32> to vector<16x128xf32>
    %37 = arith.addf %34, %36 : vector<16x128xf32>
    %cst_29 = arith.constant 0.000000e+00 : f32
    %38 = vector.broadcast %cst_29 : f32 to vector<16x128xf32>
    %39 = arith.maximumf %37, %38 : vector<16x128xf32>
    %40 = arith.truncf %39 : vector<16x128xf32> to vector<16x128xbf16>
    %c0_30 = arith.constant 0 : index
    %c0_31 = arith.constant 0 : index
    %41 = vector.load %arg12[%c0_30, %c0_31] : memref<128x128xbf16, #tpu.memory_space<vmem>>, vector<128x128xbf16>
    %cst_32 = arith.constant dense<0.000000e+00> : vector<16x128xf32>
    %42 = tpu.matmul %40, %41, %cst_32 {dimension_numbers = #tpu.dot_dimension_numbers<[1], [0], [0], [1], [0, 0, 1, 1], [], []>} : vector<16x128xbf16>, vector<128x128xbf16>, vector<16x128xf32> -> vector<16x128xf32>
    %c0_33 = arith.constant 0 : index
    %c0_34 = arith.constant 0 : index
    %43 = vector.load %arg13[%c0_33, %c0_34] : memref<1x128xf32, #tpu.memory_space<vmem>>, vector<1x128xf32>
    %44 = vector.broadcast %43 : vector<1x128xf32> to vector<16x128xf32>
    %45 = arith.addf %42, %44 : vector<16x128xf32>
    %cst_35 = arith.constant dense<0xFF800000> : vector<16xf32>
    %46 = vector.multi_reduction <maximumf>, %45, %cst_35 [1] : vector<16x128xf32> to vector<16xf32>
    %47 = vector.shape_cast %46 : vector<16xf32> to vector<16x1xf32>
    %48 = vector.broadcast %47 : vector<16x1xf32> to vector<16x128xf32>
    %49 = arith.subf %45, %48 : vector<16x128xf32>
    %50 = math.exp %49 : vector<16x128xf32>
    %cst_36 = arith.constant dense<0.000000e+00> : vector<16xf32>
    %51 = vector.multi_reduction <add>, %50, %cst_36 [1] : vector<16x128xf32> to vector<16xf32>
    %52 = vector.shape_cast %51 : vector<16xf32> to vector<16x1xf32>
    %53 = math.log %52 : vector<16x1xf32>
    %54 = vector.broadcast %53 : vector<16x1xf32> to vector<16x128xf32>
    %55 = arith.subf %49, %54 : vector<16x128xf32>
    %c0_37 = arith.constant 0 : index
    %c0_38 = arith.constant 0 : index
    %56 = vector.load %arg14[%c0_37, %c0_38] : memref<16x128xf32, #tpu.memory_space<vmem>>, vector<16x128xf32>
    tpu.vector_store %arg14[%c0_37, %c0_38], %55 {strides = array<i32>} : memref<16x128xf32, #tpu.memory_space<vmem>>, vector<16x128xf32>,
    return
  }
  func.func @transform_0(%arg0: i32) -> (i32, i32) {
    %c0_i32 = arith.constant 0 : i32
    %c0_i32_0 = arith.constant 0 : i32
    return %arg0, %c0_i32 : i32, i32
  }
  func.func @transform_1(%arg0: i32) -> (i32, i32) {
    %c0_i32 = arith.constant 0 : i32
    %c0_i32_0 = arith.constant 0 : i32
    %c0_i32_1 = arith.constant 0 : i32
    return %c0_i32, %c0_i32_0 : i32, i32
  }
  func.func @transform_2(%arg0: i32) -> (i32, i32) {
    %c0_i32 = arith.constant 0 : i32
    %c0_i32_0 = arith.constant 0 : i32
    %c0_i32_1 = arith.constant 0 : i32
    return %c0_i32, %c0_i32_0 : i32, i32
  }
  func.func @transform_3(%arg0: i32) -> (i32, i32) {
    %c0_i32 = arith.constant 0 : i32
    %c0_i32_0 = arith.constant 0 : i32
    %c0_i32_1 = arith.constant 0 : i32
    return %c0_i32, %c0_i32_0 : i32, i32
  }
  func.func @transform_4(%arg0: i32) -> (i32, i32) {
    %c0_i32 = arith.constant 0 : i32
    %c0_i32_0 = arith.constant 0 : i32
    %c0_i32_1 = arith.constant 0 : i32
    return %c0_i32, %c0_i32_0 : i32, i32
  }
  func.func @transform_5(%arg0: i32) -> (i32, i32) {
    %c0_i32 = arith.constant 0 : i32
    %c0_i32_0 = arith.constant 0 : i32
    %c0_i32_1 = arith.constant 0 : i32
    return %c0_i32, %c0_i32_0 : i32, i32
  }
  func.func @transform_6(%arg0: i32) -> (i32, i32) {
    %c0_i32 = arith.constant 0 : i32
    %c0_i32_0 = arith.constant 0 : i32
    %c0_i32_1 = arith.constant 0 : i32
    return %c0_i32, %c0_i32_0 : i32, i32
  }
  func.func @transform_7(%arg0: i32) -> (i32, i32) {
    %c0_i32 = arith.constant 0 : i32
    %c0_i32_0 = arith.constant 0 : i32
    %c0_i32_1 = arith.constant 0 : i32
    return %c0_i32, %c0_i32_0 : i32, i32
  }
  func.func @transform_8(%arg0: i32) -> (i32, i32) {
    %c0_i32 = arith.constant 0 : i32
    %c0_i32_0 = arith.constant 0 : i32
    %c0_i32_1 = arith.constant 0 : i32
    return %c0_i32, %c0_i32_0 : i32, i32
  }
  func.func @transform_9(%arg0: i32) -> (i32, i32) {
    %c0_i32 = arith.constant 0 : i32
    %c0_i32_0 = arith.constant 0 : i32
    %c0_i32_1 = arith.constant 0 : i32
    return %c0_i32, %c0_i32_0 : i32, i32
  }
  func.func @transform_10(%arg0: i32) -> (i32, i32) {
    %c0_i32 = arith.constant 0 : i32
    %c0_i32_0 = arith.constant 0 : i32
    %c0_i32_1 = arith.constant 0 : i32
    return %c0_i32, %c0_i32_0 : i32, i32
  }
  func.func @transform_11(%arg0: i32) -> (i32, i32) {
    %c0_i32 = arith.constant 0 : i32
    %c0_i32_0 = arith.constant 0 : i32
    %c0_i32_1 = arith.constant 0 : i32
    return %c0_i32, %c0_i32_0 : i32, i32
  }
  func.func @transform_12(%arg0: i32) -> (i32, i32) {
    %c0_i32 = arith.constant 0 : i32
    %c0_i32_0 = arith.constant 0 : i32
    %c0_i32_1 = arith.constant 0 : i32
    return %c0_i32, %c0_i32_0 : i32, i32
  }
  func.func @transform_13(%arg0: i32) -> (i32, i32) {
    %c0_i32 = arith.constant 0 : i32
    %c0_i32_0 = arith.constant 0 : i32
    return %arg0, %c0_i32 : i32, i32
  }
}

</mosaic_0001>

<bundles_post_ra>
// kernel: tpu_custom_call.1
= control target key start
LH: loop header
LB: loop body
LE: loop exit
PB: predicated region body
PF: predicated region fallthrough
CT: control target
= control target key end

     0   :  { %18 = vsyncpa [#allocation3], 0  ;;  %s2697_s0 = inlined_call_operand.hbm [shape: bf16[16,64], index: 0, kind: input, shape index: {}]   ;;  %s2698_s1 = inlined_call_operand.hbm [shape: bf16[64,128], index: 1, kind: input, shape index: {}]   ;;  %s2699_s2 = inlined_call_operand.vmem [shape: f32[1,128], index: 2, kind: input, shape index: {}]   ;;  %s2700_s3 = inlined_call_operand.hbm [shape: bf16[128,256], index: 3, kind: input, shape index: {}]   ;;  %s2701_s4 = inlined_call_operand.vmem [shape: f32[1,256], index: 4, kind: input, shape index: {}]   ;;  %s2702_s5 = inlined_call_operand.hbm [shape: bf16[256,512], index: 5, kind: input, shape index: {}]   ;;  %s2703_s6 = inlined_call_operand.vmem [shape: f32[1,512], index: 6, kind: input, shape index: {}]   ;;  %s2704_s7 = inlined_call_operand.hbm [shape: bf16[512,256], index: 7, kind: input, shape index: {}]   ;;  %s2705_s8 = inlined_call_operand.vmem [shape: f32[1,256], index: 8, kind: input, shape index: {}]   ;;  %s2706_s9 = inlined_call_operand.hbm [shape: bf16[256,128], index: 9, kind: input, shape index: {}]   ;;  %s2707_s10 = inlined_call_operand.vmem [shape: f32[1,128], index: 10, kind: input, shape index: {}]   ;;  %s2708_s11 = inlined_call_operand.hbm [shape: bf16[128,128], index: 11, kind: input, shape index: {}]   ;;  %s2709_s12 = inlined_call_operand.vmem [shape: f32[1,128], index: 12, kind: input, shape index: {}]   ;;  %s2710_s13 = inlined_call_operand.hbm [shape: f32[16,128], index: 13, kind: output, shape index: {}]  }
   0x1   :  { %19 = vsyncpa [#allocation6], 0 }
   0x2   :  { %20 = vsyncpa [#allocation9], 0 }
   0x3   :  { %21 = vsyncpa [#allocation12], 0 }
   0x4   :  { %22 = vsyncpa [#allocation4], 0  ;;  %s2426_s25 = smov [#allocation5]   ;;  %s2427_s27 = smov [#allocation8]  }
   0x5   :  { %s40_s26 = sshll.u32 %s2426_s25, 4  ;;  %s68_s28 = sshll.u32 %s2427_s27, 4  ;;  %s41_s26 = int_to_ptr.vmem [resolvable:$true] %s40_s26  ;;  %s2513_s28 = int_to_ptr.vmem [resolvable:$true] %s68_s28 }
   0x6   :  { %s2240_s14 = scalar_lea.hbm %s2698_s1, 512 }
   0x7   :  { %p2241_p0 = scmp.ne.s32.totalorder %s2698_s1, %s2240_s14  ;;  %p2244_p1 = scmp.lt.u32.totalorder %s2240_s14, %s2698_s1 }
   0x9   :  { %p2246_p2 = pnand %p2244_p1, %p2241_p0 }
   0xb   :  { %2249 = shalt.err (!%p2246_p2)
}
   0xc   :  { %s2250_s19 = scalar_lea.vmem %s41_s26, 512  ;;  %p2255_p4 = scmp.lt.s32.totalorder %s41_s26, %s41_s26 }
   0xd   :  { %p2251_p3 = scmp.ne.s32.totalorder %s41_s26, %s2250_s19  ;;  %p2256_p5 = scmp.lt.s32.totalorder %s2250_s19, %s2250_s19 }
   0xf   :  { %p2257_p6 = por %p2256_p5, %p2255_p4 }
  0x11   :  { %p2258_p7 = pnand %p2257_p6, %p2251_p3 }
  0x13   :  { %2261 = shalt.err (!%p2258_p7)
}
  0x14   :  { %s2428_s20 = smov 64   ;;  %s2429_s21 = smov 4  }
  0x15   :  { %46 = dma.hbm_to_vmem [thread:$0]  %s2698_s1, 512, %s41_s26, [#allocation6], %s2428_s20, %s2428_s20, %s2429_s21  }
  0x16   :  { %s2262_s27 = scalar_lea.hbm %s2702_s5, 8192 }
  0x17   :  { %p2263_p8 = scmp.ne.s32.totalorder %s2702_s5, %s2262_s27  ;;  %p2266_p9 = scmp.lt.u32.totalorder %s2262_s27, %s2702_s5 }
  0x19   :  { %p2268_p10 = pnand %p2266_p9, %p2263_p8 }
  0x1b   :  { %2271 = shalt.err (!%p2268_p10)
}
  0x1c   :  { %s2272_s16 = scalar_lea.vmem %s2513_s28, 8192  ;;  %p2277_p12 = scmp.lt.s32.totalorder %s2513_s28, %s2513_s28 }
  0x1d   :  { %p2273_p11 = scmp.ne.s32.totalorder %s2513_s28, %s2272_s16  ;;  %p2278_p13 = scmp.lt.s32.totalorder %s2272_s16, %s2272_s16 }
  0x1f   :  { %p2279_p0 = por %p2278_p13, %p2277_p12 }
  0x21   :  { %p2280_p1 = pnand %p2279_p0, %p2273_p11 }
  0x23   :  { %2283 = shalt.err (!%p2280_p1)
}
  0x24   :  { %s2430_s1 = smov 256   ;;  %s2431_s26 = smov 16  }
  0x25   :  { %74 = dma.hbm_to_vmem [thread:$0]  %s2702_s5, 8192, %s2513_s28, [#allocation9], %s2430_s1, %s2430_s1, %s2431_s26  }
  0x26   :  { %s2432_s19 = smov [#allocation11]   ;;  %s2433_s23 = smov [#allocation2]  }
  0x27   :  { %s96_s22 = sshll.u32 %s2432_s19, 4  ;;  %s28_s24 = sshll.u32 %s2433_s23, 4  ;;  %s97_s22 = int_to_ptr.vmem [resolvable:$true] %s96_s22  ;;  %s2547_s24 = int_to_ptr.vmem [resolvable:$true] %s28_s24 }
  0x28   :  { %s2284_s29 = scalar_lea.hbm %s2706_s9, 2048 }
  0x29   :  { %p2285_p2 = scmp.ne.s32.totalorder %s2706_s9, %s2284_s29  ;;  %p2288_p3 = scmp.lt.u32.totalorder %s2284_s29, %s2706_s9 }
  0x2b   :  { %p2290_p4 = pnand %p2288_p3, %p2285_p2 }
  0x2d   :  { %2293 = shalt.err (!%p2290_p4)
}
  0x2e   :  { %s2294_s5 = scalar_lea.vmem %s97_s22, 2048  ;;  %p2299_p6 = scmp.lt.s32.totalorder %s97_s22, %s97_s22 }
  0x2f   :  { %p2295_p5 = scmp.ne.s32.totalorder %s97_s22, %s2294_s5  ;;  %p2300_p7 = scmp.lt.s32.totalorder %s2294_s5, %s2294_s5 }
  0x31   :  { %p2301_p8 = por %p2300_p7, %p2299_p6 }
  0x33   :  { %p2302_p9 = pnand %p2301_p8, %p2295_p5 }
  0x35   :  { %2305 = shalt.err (!%p2302_p9)
}
  0x36   :  { %102 = dma.hbm_to_vmem [thread:$0]  %s2706_s9, 2048, %s97_s22, [#allocation12], %s2428_s20, %s2428_s20, %s2429_s21  }
  0x37   :  { %s2306_s18 = scalar_lea.hbm %s2697_s0, 128 }
  0x38   :  { %p2307_p10 = scmp.ne.s32.totalorder %s2697_s0, %s2306_s18  ;;  %p2310_p11 = scmp.lt.u32.totalorder %s2306_s18, %s2697_s0 }
  0x3a   :  { %p2312_p12 = pnand %p2310_p11, %p2307_p10 }
  0x3c   :  { %2315 = shalt.err (!%p2312_p12)
}
  0x3d   :  { %s2316_s29 = scalar_lea.vmem %s2547_s24, 128  ;;  %p2321_p0 = scmp.lt.s32.totalorder %s2547_s24, %s2547_s24 }
  0x3e   :  { %p2317_p13 = scmp.ne.s32.totalorder %s2547_s24, %s2316_s29  ;;  %p2322_p1 = scmp.lt.s32.totalorder %s2316_s29, %s2316_s29 }
  0x40   :  { %p2323_p2 = por %p2322_p1, %p2321_p0 }
  0x42   :  { %p2324_p3 = pnand %p2323_p2, %p2317_p13 }
  0x44   :  { %2327 = shalt.err (!%p2324_p3)
}
  0x45   :  { %34 = dma.hbm_to_vmem [thread:$0]  %s2697_s0, 128, %s2547_s24, [#allocation3], %s2428_s20, %s2428_s20, %s2429_s21  }
  0x46   :  { %s2434_s30 = smov [#allocation7]   ;;  %s2328_s5 = scalar_lea.hbm %s2700_s3, 2048 }
  0x47   :  { %s54_s14 = sshll.u32 %s2434_s30, 4  ;;  %p2329_p4 = scmp.ne.s32.totalorder %s2700_s3, %s2328_s5  ;;  %s55_s14 = int_to_ptr.vmem [resolvable:$true] %s54_s14 }
  0x48   :  { %p2332_p5 = scmp.lt.u32.totalorder %s2328_s5, %s2700_s3 }
  0x4a   :  { %p2334_p6 = pnand %p2332_p5, %p2329_p4 }
  0x4c   :  { %2337 = shalt.err (!%p2334_p6)
}
  0x4d   :  { %s2338_s18 = scalar_lea.vmem %s55_s14, 2048  ;;  %p2343_p8 = scmp.lt.s32.totalorder %s55_s14, %s55_s14 }
  0x4e   :  { %p2339_p7 = scmp.ne.s32.totalorder %s55_s14, %s2338_s18  ;;  %p2344_p9 = scmp.lt.s32.totalorder %s2338_s18, %s2338_s18 }
  0x50   :  { %p2345_p10 = por %p2344_p9, %p2343_p8 }
  0x52   :  { %p2346_p11 = pnand %p2345_p10, %p2339_p7 }
  0x54   :  { %2349 = shalt.err (!%p2346_p11)
}
  0x55   :  { %s2435_s0 = smov 128   ;;  %s2436_s24 = smov 8  }
  0x56   :  { %60 = dma.hbm_to_vmem [thread:$0]  %s2700_s3, 2048, %s55_s14, [#allocation6], %s2435_s0, %s2435_s0, %s2436_s24  }
  0x57   :  { %s2437_s25 = smov [#allocation10]   ;;  %s2438_s29 = smov [#allocation13]  }
  0x58   :  { %s82_s27 = sshll.u32 %s2437_s25, 4  ;;  %s110_s9 = sshll.u32 %s2438_s29, 4  ;;  %s83_s27 = int_to_ptr.vmem [resolvable:$true] %s82_s27  ;;  %s111_s9 = int_to_ptr.vmem [resolvable:$true] %s110_s9 }
  0x59   :  { %s2350_s15 = scalar_lea.hbm %s2704_s7, 8192 }
  0x5a   :  { %p2351_p12 = scmp.ne.s32.totalorder %s2704_s7, %s2350_s15  ;;  %p2354_p13 = scmp.lt.u32.totalorder %s2350_s15, %s2704_s7 }
  0x5c   :  { %p2356_p0 = pnand %p2354_p13, %p2351_p12 }
  0x5e   :  { %2359 = shalt.err (!%p2356_p0)
}
  0x5f   :  { %s2360_s3 = scalar_lea.vmem %s83_s27, 8192  ;;  %p2365_p2 = scmp.lt.s32.totalorder %s83_s27, %s83_s27 }
  0x60   :  { %p2361_p1 = scmp.ne.s32.totalorder %s83_s27, %s2360_s3  ;;  %p2366_p3 = scmp.lt.s32.totalorder %s2360_s3, %s2360_s3 }
  0x62   :  { %p2367_p4 = por %p2366_p3, %p2365_p2 }
  0x64   :  { %p2368_p5 = pnand %p2367_p4, %p2361_p1 }
  0x66   :  { %2371 = shalt.err (!%p2368_p5)
}
  0x67   :  { %88 = dma.hbm_to_vmem [thread:$0]  %s2704_s7, 8192, %s83_s27, [#allocation9], %s2435_s0, %s2435_s0, %s2436_s24  }
  0x68   :  { %s2372_s19 = scalar_lea.hbm %s2708_s11, 1024 }
  0x69   :  { %p2373_p6 = scmp.ne.s32.totalorder %s2708_s11, %s2372_s19  ;;  %p2376_p7 = scmp.lt.u32.totalorder %s2372_s19, %s2708_s11 }
  0x6b   :  { %p2378_p8 = pnand %p2376_p7, %p2373_p6 }
  0x6d   :  { %2381 = shalt.err (!%p2378_p8)
}
  0x6e   :  { %s2382_s30 = scalar_lea.vmem %s111_s9, 1024  ;;  %p2387_p10 = scmp.lt.s32.totalorder %s111_s9, %s111_s9 }
  0x6f   :  { %p2383_p9 = scmp.ne.s32.totalorder %s111_s9, %s2382_s30  ;;  %p2388_p11 = scmp.lt.s32.totalorder %s2382_s30, %s2382_s30 }
  0x71   :  { %p2389_p12 = por %p2388_p11, %p2387_p10 }
  0x73   :  { %p2390_p13 = pnand %p2389_p12, %p2383_p9 }
  0x75   :  { %2393 = shalt.err (!%p2390_p13)
}
  0x76   :  { %116 = dma.hbm_to_vmem [thread:$0]  %s2708_s11, 1024, %s111_s9, [#allocation12], %s2428_s20, %s2428_s20, %s2429_s21  }
  0x77   :  { %2416 = dma.done.wait [#allocation3], 128  }
  0x78   :  { %2417 = vsyncadd [#allocation3], 4294967168 }
  0x79   :  { %2418 = dma.done.wait [#allocation6], 2560  }
  0x7a   :  { %2419 = vsyncadd [#allocation6], 4294964736 }
  0x7b   :  { %2420 = dma.done.wait [#allocation9], 16384  }
  0x7c   :  { %2421 = vsyncadd [#allocation9], 4294950912 }
  0x7d   :  { %2422 = dma.done.wait [#allocation12], 3072  }
  0x7e   :  { %2423 = vsyncadd [#allocation12], 4294964224  ;;  %v2439_v0 = vmov 0.0   ;;  %vm2440_vm0 = vmmov 0   ;;  %v1987_v1 = vld [vmem:[#allocation5] sm:$0xff]   ;;  %v1988_v2 = vld [vmem:[#allocation5 + $0x8] sm:$0xff]  }
  0x7f   :  { %1930 = vmatprep.subr.bf16.mxu1 %v2439_v0  ;;  %1938 = vmatprep.mubr.msk.bf16.mxu1 %vm2440_vm0, %v2439_v0  ;;  %v1989_v3 = vld [vmem:[#allocation5 + $0x10] sm:$0xff]   ;;  %v1990_v4 = vld [vmem:[#allocation5 + $0x18] sm:$0xff]   ;;  %v1994_v5 = vld [vmem:[#allocation7 + $0x4] ss:$8 sps:$4 sm:$0xff]   ;;  %vm187_vm1 = vcmask 523264   ;;  %v2441_v22 = vmov 0  }
  0x80   :  { %1931 = vmatpush3.bf16.msra.mxu1 %v1987_v1  ;;  %v1991_v6 = vld [vmem:[#allocation2] sm:$0xff]   ;;  %v1992_v7 = vld [vmem:[#allocation7] ss:$8 sps:$4 sm:$0xff]   ;;  %v2000_v10 = vld [vmem:[#allocation7 + $0x24] ss:$8 sps:$4 sm:$0xff]  }
  0x81   :  { %1932 = vmatprep.subr.bf16.mxu1 %v2439_v0  ;;  %v1997_v8 = vld [vmem:[#allocation7 + $0x14] ss:$8 sps:$4 sm:$0xff]   ;;  %v1995_v9 = vld [vmem:[#allocation7 + $0x10] ss:$8 sps:$4 sm:$0xff]   ;;  %v1998_v11 = vld [vmem:[#allocation7 + $0x20] ss:$8 sps:$4 sm:$0xff]  }
  0x82   :  { %v2003_v12 = vld [vmem:[#allocation7 + $0x34] ss:$8 sps:$4 sm:$0xff]   ;;  %v2001_v13 = vld [vmem:[#allocation7 + $0x30] ss:$8 sps:$4 sm:$0xff]   ;;  %v2006_v14 = vld [vmem:[#allocation7 + $0x44] ss:$8 sps:$4 sm:$0xff]  }
  0x83   :  { %v2004_v15 = vld [vmem:[#allocation7 + $0x40] ss:$8 sps:$4 sm:$0xff]   ;;  %v2009_v16 = vld [vmem:[#allocation7 + $0x54] ss:$8 sps:$4 sm:$0xff]   ;;  %v2007_v17 = vld [vmem:[#allocation7 + $0x50] ss:$8 sps:$4 sm:$0xff]  }
  0x84   :  { %1933 = vmatpush3.bf16.msra.mxu1 %v1988_v2  ;;  %v2012_v18 = vld [vmem:[#allocation7 + $0x64] ss:$8 sps:$4 sm:$0xff]   ;;  %v2010_v19 = vld [vmem:[#allocation7 + $0x60] ss:$8 sps:$4 sm:$0xff]   ;;  %v2015_v20 = vld [vmem:[#allocation7 + $0x74] ss:$8 sps:$4 sm:$0xff]  }
  0x85   :  { %1934 = vmatprep.subr.bf16.mxu1 %v2439_v0  ;;  %v2013_v21 = vld [vmem:[#allocation7 + $0x70] ss:$8 sps:$4 sm:$0xff]   ;;  %v2016_v23 = vld [vmem:[#allocation8 + $0x4] ss:$16 sps:$4 sm:$0xff]   ;;  %v2020_v24 = vld [vmem:[#allocation8 + $0xc] ss:$16 sps:$4 sm:$0xff]  }
  0x86   :  { %v2021_v25 = vld [vmem:[#allocation8] ss:$16 sps:$4 sm:$0xff]   ;;  %v2022_v26 = vld [vmem:[#allocation8 + $0x24] ss:$16 sps:$4 sm:$0xff]   ;;  %798 = vmatprep.subr.bf16.mxu0 %v2016_v23  ;;  %v1717_v51 = vld [vmem:[%s2699_s2] ss:$0 sm:$0xff] }
  0x87   :  { %799 = vmatpush1.bf16.msra.mxu0 %v2021_v25  ;;  %v2027_v27 = vld [vmem:[#allocation8 + $0x20] ss:$16 sps:$4 sm:$0xff]   ;;  %v2028_v28 = vld [vmem:[#allocation8 + $0x44] ss:$16 sps:$4 sm:$0xff]   ;;  %v2018_v60 = vld [vmem:[#allocation8 + $0x8] ss:$16 sps:$4 sm:$0xff]  }
  0x88   :  { %1935 = vmatpush3.bf16.msra.mxu1 %v1989_v3  ;;  %800 = vmatprep.subr.bf16.mxu0 %v2022_v26  ;;  %v2033_v29 = vld [vmem:[#allocation8 + $0x40] ss:$16 sps:$4 sm:$0xff]   ;;  %v2034_v30 = vld [vmem:[#allocation8 + $0x64] ss:$16 sps:$4 sm:$0xff]   ;;  %v2026_v62 = vld [vmem:[#allocation8 + $0x2c] ss:$16 sps:$4 sm:$0xff]  }
  0x89   :  { %1936 = vmatprep.subr.bf16.mxu1 %v2439_v0  ;;  %v2039_v31 = vld [vmem:[#allocation8 + $0x60] ss:$16 sps:$4 sm:$0xff]   ;;  %v2040_v32 = vld [vmem:[#allocation8 + $0x84] ss:$16 sps:$4 sm:$0xff]   ;;  %v2024_v63 = vld [vmem:[#allocation8 + $0x28] ss:$16 sps:$4 sm:$0xff]  }
  0x8a   :  { %v2045_v33 = vld [vmem:[#allocation8 + $0x80] ss:$16 sps:$4 sm:$0xff]   ;;  %v2046_v34 = vld [vmem:[#allocation8 + $0xa4] ss:$16 sps:$4 sm:$0xff]   ;;  %v2032_v1 = vld [vmem:[#allocation8 + $0x4c] ss:$16 sps:$4 sm:$0xff]  }
  0x8b   :  { %801 = vmatpush1.bf16.msra.mxu0 %v2027_v27  ;;  %v2051_v35 = vld [vmem:[#allocation8 + $0xa0] ss:$16 sps:$4 sm:$0xff]   ;;  %v2052_v36 = vld [vmem:[#allocation8 + $0xc4] ss:$16 sps:$4 sm:$0xff]   ;;  %v2030_v2 = vld [vmem:[#allocation8 + $0x48] ss:$16 sps:$4 sm:$0xff]  }
  0x8c   :  { %1937 = vmatpush3.bf16.msra.mxu1 %v1990_v4  ;;  %802 = vmatprep.subr.bf16.mxu0 %v2028_v28  ;;  %v2057_v37 = vld [vmem:[#allocation8 + $0xc0] ss:$16 sps:$4 sm:$0xff]   ;;  %v2058_v38 = vld [vmem:[#allocation8 + $0xe4] ss:$16 sps:$4 sm:$0xff]   ;;  %v2038_v3 = vld [vmem:[#allocation8 + $0x6c] ss:$16 sps:$4 sm:$0xff]  }
  0x8d   :  { %343 = vmatprep.subr.bf16.mxu1 %v1994_v5  ;;  %v2063_v39 = vld [vmem:[#allocation8 + $0xe0] ss:$16 sps:$4 sm:$0xff]   ;;  %v2064_v40 = vld [vmem:[#allocation8 + $0x104] ss:$16 sps:$4 sm:$0xff]   ;;  %v2036_v4 = vld [vmem:[#allocation8 + $0x68] ss:$16 sps:$4 sm:$0xff]  }
  0x8e   :  { %v2069_v41 = vld [vmem:[#allocation8 + $0x100] ss:$16 sps:$4 sm:$0xff]   ;;  %v2070_v42 = vld [vmem:[#allocation8 + $0x124] ss:$16 sps:$4 sm:$0xff]   ;;  %v2044_v5 = vld [vmem:[#allocation8 + $0x8c] ss:$16 sps:$4 sm:$0xff]  }
  0x8f   :  { %1939 = vmatmul.mubr.msk.bf16.vlgmr.msra.gmra.mrb[0].mxu1 %vm187_vm1, %v1991_v6  ;;  %803 = vmatpush1.bf16.msra.mxu0 %v2033_v29  ;;  %v2075_v43 = vld [vmem:[#allocation8 + $0x120] ss:$16 sps:$4 sm:$0xff]   ;;  %v2076_v44 = vld [vmem:[#allocation8 + $0x144] ss:$16 sps:$4 sm:$0xff]   ;;  %v2042_v6 = vld [vmem:[#allocation8 + $0x88] ss:$16 sps:$4 sm:$0xff]  }
  0x90   :  { %344 = vmatpush1.bf16.msra.mxu1 %v1992_v7  ;;  %375 = vmatprep.mubr.bf16.mxu1 %v2441_v22  ;;  %v2081_v45 = vld [vmem:[#allocation8 + $0x140] ss:$16 sps:$4 sm:$0xff]   ;;  %v2082_v46 = vld [vmem:[#allocation8 + $0x164] ss:$16 sps:$4 sm:$0xff]   ;;  %v2050_v7 = vld [vmem:[#allocation8 + $0xac] ss:$16 sps:$4 sm:$0xff]  }
  0x91   :  { %345 = vmatprep.subr.bf16.mxu1 %v1997_v8  ;;  %804 = vmatprep.subr.bf16.mxu0 %v2034_v30  ;;  %v2087_v47 = vld [vmem:[#allocation8 + $0x160] ss:$16 sps:$4 sm:$0xff]   ;;  %v2088_v48 = vld [vmem:[#allocation8 + $0x184] ss:$16 sps:$4 sm:$0xff]   ;;  %v2048_v8 = vld [vmem:[#allocation8 + $0xa8] ss:$16 sps:$4 sm:$0xff]  }
  0x92   :  { %v2093_v49 = vld [vmem:[#allocation8 + $0x180] ss:$16 sps:$4 sm:$0xff]   ;;  %v2094_v50 = vld [vmem:[#allocation8 + $0x1a4] ss:$16 sps:$4 sm:$0xff]   ;;  %v2090_v22 = vld [vmem:[#allocation8 + $0x188] ss:$16 sps:$4 sm:$0xff]  }
  0x93   :  { %805 = vmatpush1.bf16.msra.mxu0 %v2039_v31  ;;  %v2098_v23 = vld [vmem:[#allocation8 + $0x1ac] ss:$16 sps:$4 sm:$0xff]   ;;  %v2099_v25 = vld [vmem:[#allocation8 + $0x1a0] ss:$16 sps:$4 sm:$0xff]   ;;  %v2100_v26 = vld [vmem:[#allocation8 + $0x1c4] ss:$16 sps:$4 sm:$0xff]  }
  0x94   :  { %346 = vmatpush1.bf16.msra.mxu1 %v1995_v9  ;;  %806 = vmatprep.subr.bf16.mxu0 %v2040_v32  ;;  %v2056_v9 = vld [vmem:[#allocation8 + $0xcc] ss:$16 sps:$4 sm:$0xff]   ;;  %v2102_v28 = vld [vmem:[#allocation8 + $0x1c8] ss:$16 sps:$4 sm:$0xff]   ;;  %v2105_v29 = vld [vmem:[#allocation8 + $0x1c0] ss:$16 sps:$4 sm:$0xff]  }
  0x95   :  { %347 = vmatprep.subr.bf16.mxu1 %v2000_v10  ;;  %v2054_v10 = vld [vmem:[#allocation8 + $0xc8] ss:$16 sps:$4 sm:$0xff]   ;;  %v2104_v27 = vld [vmem:[#allocation8 + $0x1cc] ss:$16 sps:$4 sm:$0xff]   ;;  %v2106_v30 = vld [vmem:[#allocation8 + $0x1e4] ss:$16 sps:$4 sm:$0xff]  }
  0x96   :  { %v2110_v31 = vld [vmem:[#allocation8 + $0x1ec] ss:$16 sps:$4 sm:$0xff]   ;;  %v2108_v32 = vld [vmem:[#allocation8 + $0x1e8] ss:$16 sps:$4 sm:$0xff]  }
  0x97   :  { %807 = vmatpush1.bf16.msra.mxu0 %v2045_v33  ;;  %v2111_v33 = vld [vmem:[#allocation8 + $0x1e0] ss:$16 sps:$4 sm:$0xff]  }
  0x98   :  { %348 = vmatpush1.bf16.msra.mxu1 %v1998_v11  ;;  %808 = vmatprep.subr.bf16.mxu0 %v2046_v34  ;;  %v2062_v11 = vld [vmem:[#allocation8 + $0xec] ss:$16 sps:$4 sm:$0xff]  }
  0x99   :  { %349 = vmatprep.subr.bf16.mxu1 %v2003_v12  ;;  %v2060_v12 = vld [vmem:[#allocation8 + $0xe8] ss:$16 sps:$4 sm:$0xff]   ;;  %v2114_v34 = vld [vmem:[#allocation10 + $0x4] ss:$8 sps:$4 sm:$0xff]  }
  0x9b   :  { %809 = vmatpush1.bf16.msra.mxu0 %v2051_v35  ;;  %v253_v35 = vlaneseq }
  0x9c   :  { %350 = vmatpush1.bf16.msra.mxu1 %v2001_v13  ;;  %810 = vmatprep.subr.bf16.mxu0 %v2052_v36  ;;  %v2068_v13 = vld [vmem:[#allocation8 + $0x10c] ss:$16 sps:$4 sm:$0xff]  }
  0x9d   :  { %351 = vmatprep.subr.bf16.mxu1 %v2006_v14  ;;  %v2066_v14 = vld [vmem:[#allocation8 + $0x108] ss:$16 sps:$4 sm:$0xff]   ;;  %v2638_v36 = vshrl.u32 %v253_v35, 7 }
  0x9e   :  { %v2218_v35 = vld [vmem:[#allocation11 + $0x68] sm:$0xff]  }
  0x9f   :  { %811 = vmatpush1.bf16.msra.mxu0 %v2057_v37  ;;  %v2641_v37 = vsub.s32 0, %v2638_v36 }
  0xa0   :  { %352 = vmatpush1.bf16.msra.mxu1 %v2004_v15  ;;  %812 = vmatprep.subr.bf16.mxu0 %v2058_v38  ;;  %v2074_v15 = vld [vmem:[#allocation8 + $0x12c] ss:$16 sps:$4 sm:$0xff]   ;;  %v251_v38 = vld [vmem:[%s2701_s4] sm:$0x3] }
  0xa1   :  { %353 = vmatprep.subr.bf16.mxu1 %v2009_v16  ;;  %v2072_v16 = vld [vmem:[#allocation8 + $0x128] ss:$16 sps:$4 sm:$0xff]  }
  0xa3   :  { %813 = vmatpush1.bf16.msra.mxu0 %v2063_v39  ;;  %v2647_v39 = vsub.s32 1, %v2638_v36 }
  0xa4   :  { %354 = vmatpush1.bf16.msra.mxu1 %v2007_v17  ;;  %814 = vmatprep.subr.bf16.mxu0 %v2064_v40  ;;  %v2080_v17 = vld [vmem:[#allocation8 + $0x14c] ss:$16 sps:$4 sm:$0xff]   ;;  %v256_v40 = vrot.slane %v251_v38, %v2641_v37 }
  0xa5   :  { %355 = vmatprep.subr.bf16.mxu1 %v2012_v18  ;;  %v2078_v18 = vld [vmem:[#allocation8 + $0x148] ss:$16 sps:$4 sm:$0xff]  }
  0xa7   :  { %815 = vmatpush1.bf16.msra.mxu0 %v2069_v41  ;;  %v260_v41 = vrot.slane %v251_v38, %v2647_v39  ;;  %v468_v38 = vsub.s32 2, %v2638_v36 }
  0xa8   :  { %356 = vmatpush1.bf16.msra.mxu1 %v2010_v19  ;;  %816 = vmatprep.subr.bf16.mxu0 %v2070_v42  ;;  %v2086_v19 = vld [vmem:[#allocation8 + $0x16c] ss:$16 sps:$4 sm:$0xff]  }
  0xa9   :  { %357 = vmatprep.subr.bf16.mxu1 %v2015_v20  ;;  %v2084_v20 = vld [vmem:[#allocation8 + $0x168] ss:$16 sps:$4 sm:$0xff]  }
  0xab   :  { %817 = vmatpush1.bf16.msra.mxu0 %v2075_v43 }
  0xac   :  { %358 = vmatpush1.bf16.msra.mxu1 %v2013_v21  ;;  %818 = vmatprep.subr.bf16.mxu0 %v2076_v44  ;;  %v2092_v21 = vld [vmem:[#allocation8 + $0x18c] ss:$16 sps:$4 sm:$0xff]  }
  0xad   :  { %841 = vmatprep.subr.bf16.mxu1 %v2020_v24  ;;  %v2096_v24 = vld [vmem:[#allocation8 + $0x1a8] ss:$16 sps:$4 sm:$0xff]  }
  0xaf   :  { %819 = vmatpush1.bf16.msra.mxu0 %v2081_v45 }
  0xb0   :  { %820 = vmatprep.subr.bf16.mxu0 %v2082_v46 }
  0xb3   :  { %821 = vmatpush1.bf16.msra.mxu0 %v2087_v47 }
  0xb4   :  { %822 = vmatprep.subr.bf16.mxu0 %v2088_v48 }
  0xb7   :  { %823 = vmatpush1.bf16.msra.mxu0 %v2093_v49 }
  0xb8   :  { %824 = vmatprep.subr.bf16.mxu0 %v2094_v50 }
  0xbb   :  { %825 = vmatpush1.bf16.msra.mxu0 %v2099_v25  ;;  %v2208_v25 = vld [vmem:[#allocation11 + $0x40] sm:$0xff]  }
  0xbc   :  { %826 = vmatprep.subr.bf16.mxu0 %v2100_v26  ;;  %v2209_v26 = vld [vmem:[#allocation11] sm:$0xff]  }
  0xbf   :  { %827 = vmatpush1.bf16.msra.mxu0 %v2105_v29  ;;  %v2212_v29 = vld [vmem:[#allocation11 + $0x50] sm:$0xff]  }
  0xc0   :  { %828 = vmatprep.subr.bf16.mxu0 %v2106_v30  ;;  %v2213_v30 = vld [vmem:[#allocation11 + $0x10] sm:$0xff]  }
  0xc3   :  { %829 = vmatpush1.bf16.msra.mxu0 %v2111_v33  ;;  %v2216_v33 = vld [vmem:[#allocation11 + $0x60] sm:$0xff]  }
  0xc4   :  { %1292 = vmatprep.subr.bf16.mxu0 %v2114_v34  ;;  %v2217_v34 = vld [vmem:[#allocation11 + $0x20] sm:$0xff]  }
 0x162   :  { %v225_v52 = vpop.f32.mrb[0].mxu1 }
 0x163   :  { %v226_v53 = vadd.f32 %v1717_v51, %v225_v52  ;;  %v1940_v54 = vpop.f32.mrb[1].mxu1 }
 0x164   :  { %v228_v55 = vpop.f32.mrb[2].mxu1 }
 0x165   :  { %v229_v56 = vadd.f32 %v1717_v51, %v228_v55  ;;  %v1941_v57 = vpop.f32.mrb[3].mxu1  ;;  %v232_v58 = vmax.f32 %v226_v53, 0.0 }
 0x166   :  { %v2117_v57 = vld [vmem:[#allocation10 + $0x14] ss:$8 sps:$4 sm:$0xff]  }
 0x167   :  { %v233_v59 = vmax.f32 %v229_v56, 0.0  ;;  %v2112_v56 = vld [vmem:[#allocation10] ss:$8 sps:$4 sm:$0xff]  }
 0x169   :  { %v234_v61 = vpack.c.bf16 %v233_v59, %v232_v58  ;;  %v2115_v58 = vld [vmem:[#allocation10 + $0x10] ss:$8 sps:$4 sm:$0xff]   ;;  %v2120_v59 = vld [vmem:[#allocation10 + $0x24] ss:$8 sps:$4 sm:$0xff]  }
 0x16b   :  { %376 = vmatmul.mubr.bf16.vlgmr.msra.gmra.mrb[4].mxu1 %v234_v61  ;;  %v2123_v61 = vld [vmem:[#allocation10 + $0x34] ss:$8 sps:$4 sm:$0xff]  }
 0x16c   :  { %842 = vmatpush1.bf16.msra.mxu1 %v2018_v60  ;;  %v2118_v60 = vld [vmem:[#allocation10 + $0x20] ss:$8 sps:$4 sm:$0xff]  }
 0x16d   :  { %843 = vmatprep.subr.bf16.mxu1 %v2026_v62  ;;  %v2121_v62 = vld [vmem:[#allocation10 + $0x30] ss:$8 sps:$4 sm:$0xff]  }
 0x170   :  { %844 = vmatpush1.bf16.msra.mxu1 %v2024_v63  ;;  %v2126_v63 = vld [vmem:[#allocation10 + $0x44] ss:$8 sps:$4 sm:$0xff]  }
 0x171   :  { %845 = vmatprep.subr.bf16.mxu1 %v2032_v1  ;;  %v2124_v1 = vld [vmem:[#allocation10 + $0x40] ss:$8 sps:$4 sm:$0xff]  }
 0x174   :  { %846 = vmatpush1.bf16.msra.mxu1 %v2030_v2  ;;  %v2129_v2 = vld [vmem:[#allocation10 + $0x54] ss:$8 sps:$4 sm:$0xff]  }
 0x175   :  { %847 = vmatprep.subr.bf16.mxu1 %v2038_v3  ;;  %v2127_v3 = vld [vmem:[#allocation10 + $0x50] ss:$8 sps:$4 sm:$0xff]  }
 0x178   :  { %848 = vmatpush1.bf16.msra.mxu1 %v2036_v4  ;;  %v2132_v4 = vld [vmem:[#allocation10 + $0x64] ss:$8 sps:$4 sm:$0xff]  }
 0x179   :  { %849 = vmatprep.subr.bf16.mxu1 %v2044_v5  ;;  %v2130_v5 = vld [vmem:[#allocation10 + $0x60] ss:$8 sps:$4 sm:$0xff]  }
 0x17c   :  { %850 = vmatpush1.bf16.msra.mxu1 %v2042_v6  ;;  %v2135_v6 = vld [vmem:[#allocation10 + $0x74] ss:$8 sps:$4 sm:$0xff]  }
 0x17d   :  { %851 = vmatprep.subr.bf16.mxu1 %v2050_v7  ;;  %v2133_v7 = vld [vmem:[#allocation10 + $0x70] ss:$8 sps:$4 sm:$0xff]  }
 0x180   :  { %852 = vmatpush1.bf16.msra.mxu1 %v2048_v8  ;;  %v2138_v8 = vld [vmem:[#allocation10 + $0x84] ss:$8 sps:$4 sm:$0xff]  }
 0x181   :  { %853 = vmatprep.subr.bf16.mxu1 %v2056_v9  ;;  %v2136_v9 = vld [vmem:[#allocation10 + $0x80] ss:$8 sps:$4 sm:$0xff]  }
 0x184   :  { %854 = vmatpush1.bf16.msra.mxu1 %v2054_v10  ;;  %v2141_v10 = vld [vmem:[#allocation10 + $0x94] ss:$8 sps:$4 sm:$0xff]  }
 0x185   :  { %855 = vmatprep.subr.bf16.mxu1 %v2062_v11  ;;  %v2139_v11 = vld [vmem:[#allocation10 + $0x90] ss:$8 sps:$4 sm:$0xff]  }
 0x188   :  { %856 = vmatpush1.bf16.msra.mxu1 %v2060_v12  ;;  %v2144_v12 = vld [vmem:[#allocation10 + $0xa4] ss:$8 sps:$4 sm:$0xff]  }
 0x189   :  { %857 = vmatprep.subr.bf16.mxu1 %v2068_v13  ;;  %v2142_v13 = vld [vmem:[#allocation10 + $0xa0] ss:$8 sps:$4 sm:$0xff]  }
 0x18c   :  { %858 = vmatpush1.bf16.msra.mxu1 %v2066_v14  ;;  %v2147_v14 = vld [vmem:[#allocation10 + $0xb4] ss:$8 sps:$4 sm:$0xff]  }
 0x18d   :  { %859 = vmatprep.subr.bf16.mxu1 %v2074_v15  ;;  %v2145_v15 = vld [vmem:[#allocation10 + $0xb0] ss:$8 sps:$4 sm:$0xff]  }
 0x190   :  { %860 = vmatpush1.bf16.msra.mxu1 %v2072_v16  ;;  %v2150_v16 = vld [vmem:[#allocation10 + $0xc4] ss:$8 sps:$4 sm:$0xff]  }
 0x191   :  { %861 = vmatprep.subr.bf16.mxu1 %v2080_v17  ;;  %v2148_v17 = vld [vmem:[#allocation10 + $0xc0] ss:$8 sps:$4 sm:$0xff]  }
 0x194   :  { %862 = vmatpush1.bf16.msra.mxu1 %v2078_v18  ;;  %v2153_v18 = vld [vmem:[#allocation10 + $0xd4] ss:$8 sps:$4 sm:$0xff]  }
 0x195   :  { %863 = vmatprep.subr.bf16.mxu1 %v2086_v19  ;;  %v2151_v19 = vld [vmem:[#allocation10 + $0xd0] ss:$8 sps:$4 sm:$0xff]  }
 0x198   :  { %864 = vmatpush1.bf16.msra.mxu1 %v2084_v20  ;;  %v2156_v20 = vld [vmem:[#allocation10 + $0xe4] ss:$8 sps:$4 sm:$0xff]  }
 0x199   :  { %865 = vmatprep.subr.bf16.mxu1 %v2092_v21  ;;  %v2154_v21 = vld [vmem:[#allocation10 + $0xe0] ss:$8 sps:$4 sm:$0xff]  }
 0x19c   :  { %866 = vmatpush1.bf16.msra.mxu1 %v2090_v22  ;;  %v2159_v22 = vld [vmem:[#allocation10 + $0xf4] ss:$8 sps:$4 sm:$0xff]  }
 0x19d   :  { %867 = vmatprep.subr.bf16.mxu1 %v2098_v23  ;;  %v2157_v23 = vld [vmem:[#allocation10 + $0xf0] ss:$8 sps:$4 sm:$0xff]  }
 0x1a0   :  { %868 = vmatpush1.bf16.msra.mxu1 %v2096_v24  ;;  %v2162_v24 = vld [vmem:[#allocation10 + $0x104] ss:$8 sps:$4 sm:$0xff]  }
 0x1a1   :  { %869 = vmatprep.subr.bf16.mxu1 %v2104_v27  ;;  %v2210_v27 = vld [vmem:[#allocation11 + $0x48] sm:$0xff]  }
 0x1a4   :  { %870 = vmatpush1.bf16.msra.mxu1 %v2102_v28  ;;  %v2211_v28 = vld [vmem:[#allocation11 + $0x8] sm:$0xff]  }
 0x1a5   :  { %871 = vmatprep.subr.bf16.mxu1 %v2110_v31  ;;  %v2214_v31 = vld [vmem:[#allocation11 + $0x58] sm:$0xff]  }
 0x1a8   :  { %872 = vmatpush1.bf16.msra.mxu1 %v2108_v32  ;;  %v2215_v32 = vld [vmem:[#allocation11 + $0x18] sm:$0xff]  }
 0x1a9   :  { %1899 = vmatprep.subr.bf16.mxu1 %v2208_v25  ;;  %v2186_v25 = vld [vmem:[#allocation10 + $0x184] ss:$8 sps:$4 sm:$0xff]  }
 0x23e   :  { %v377_v42 = vpop.f32.mrb[4].mxu1 }
 0x23f   :  { %v378_v43 = vadd.f32 %v377_v42, %v256_v40  ;;  %v379_v44 = vpop.f32.mrb[5].mxu1 }
 0x240   :  { %v380_v45 = vadd.f32 %v379_v44, %v260_v41  ;;  %v381_v46 = vpop.f32.mrb[6].mxu1 }
 0x241   :  { %v382_v47 = vadd.f32 %v381_v46, %v256_v40  ;;  %v383_v48 = vpop.f32.mrb[7].mxu1  ;;  %v386_v50 = vmax.f32 %v378_v43, 0.0  ;;  %v456_v40 = vld [vmem:[%s2703_s6] sm:$0xf] }
 0x242   :  { %v384_v49 = vadd.f32 %v383_v48, %v260_v41  ;;  %v387_v52 = vmax.f32 %v380_v45, 0.0  ;;  %v472_v41 = vsub.s32 3, %v2638_v36  ;;  %v461_v42 = vrot.slane %v456_v40, %v2641_v37 }
 0x243   :  { %v388_v51 = vmax.f32 %v382_v47, 0.0  ;;  %v469_v43 = vrot.slane %v456_v40, %v468_v38  ;;  %v465_v44 = vrot.slane %v456_v40, %v2647_v39  ;;  %v2199_v38 = vld [vmem:[#allocation10 + $0x1d0] ss:$8 sps:$4 sm:$0xff]  }
 0x244   :  { %v389_v53 = vmax.f32 %v384_v49, 0.0  ;;  %v473_v45 = vrot.slane %v456_v40, %v472_v41  ;;  %v2204_v40 = vld [vmem:[#allocation10 + $0x1e4] ss:$8 sps:$4 sm:$0xff]   ;;  %v2202_v41 = vld [vmem:[#allocation10 + $0x1e0] ss:$8 sps:$4 sm:$0xff]  }
 0x245   :  { %v390_v54 = vpack.c.bf16 %v388_v51, %v386_v50 }
 0x246   :  { %v391_v55 = vpack.c.bf16 %v389_v53, %v387_v52 }
 0x248   :  { %830 = vmatprep.mubr.bf16.mxu0 %v391_v55  ;;  %873 = vmatprep.mubr.bf16.mxu1 %v391_v55 }
 0x249   :  { %831 = vmatmul.mubr.bf16.vlgmr.msra.gmra.mrb[0].mxu0 %v390_v54  ;;  %874 = vmatmul.mubr.bf16.vlgmr.msra.gmra.mrb[8].mxu1 %v390_v54 }
 0x24a   :  { %1293 = vmatpush1.bf16.msra.mxu0 %v2112_v56  ;;  %1900 = vmatpush3.bf16.msra.mxu1 %v2209_v26  ;;  %v2184_v26 = vld [vmem:[#allocation10 + $0x180] ss:$8 sps:$4 sm:$0xff]  }
 0x24b   :  { %1294 = vmatprep.subr.bf16.mxu0 %v2117_v57  ;;  %1901 = vmatprep.subr.bf16.mxu1 %v2210_v27  ;;  %v2189_v27 = vld [vmem:[#allocation10 + $0x194] ss:$8 sps:$4 sm:$0xff]  }
 0x24e   :  { %1295 = vmatpush1.bf16.msra.mxu0 %v2115_v58  ;;  %1902 = vmatpush3.bf16.msra.mxu1 %v2211_v28  ;;  %v2187_v28 = vld [vmem:[#allocation10 + $0x190] ss:$8 sps:$4 sm:$0xff]  }
 0x24f   :  { %1296 = vmatprep.subr.bf16.mxu0 %v2120_v59  ;;  %1903 = vmatprep.subr.bf16.mxu1 %v2212_v29  ;;  %v2192_v29 = vld [vmem:[#allocation10 + $0x1a4] ss:$8 sps:$4 sm:$0xff]  }
 0x252   :  { %1297 = vmatpush1.bf16.msra.mxu0 %v2118_v60  ;;  %1904 = vmatpush3.bf16.msra.mxu1 %v2213_v30  ;;  %v2190_v30 = vld [vmem:[#allocation10 + $0x1a0] ss:$8 sps:$4 sm:$0xff]  }
 0x253   :  { %1298 = vmatprep.subr.bf16.mxu0 %v2123_v61  ;;  %1905 = vmatprep.subr.bf16.mxu1 %v2214_v31  ;;  %v2195_v31 = vld [vmem:[#allocation10 + $0x1b4] ss:$8 sps:$4 sm:$0xff]  }
 0x256   :  { %1299 = vmatpush1.bf16.msra.mxu0 %v2121_v62  ;;  %1906 = vmatpush3.bf16.msra.mxu1 %v2215_v32  ;;  %v2193_v32 = vld [vmem:[#allocation10 + $0x1b0] ss:$8 sps:$4 sm:$0xff]  }
 0x257   :  { %1300 = vmatprep.subr.bf16.mxu0 %v2126_v63  ;;  %1907 = vmatprep.subr.bf16.mxu1 %v2216_v33  ;;  %v2198_v33 = vld [vmem:[#allocation10 + $0x1c4] ss:$8 sps:$4 sm:$0xff]  }
 0x25a   :  { %1301 = vmatpush1.bf16.msra.mxu0 %v2124_v1  ;;  %1908 = vmatpush3.bf16.msra.mxu1 %v2217_v34  ;;  %v2196_v34 = vld [vmem:[#allocation10 + $0x1c0] ss:$8 sps:$4 sm:$0xff]  }
 0x25b   :  { %1302 = vmatprep.subr.bf16.mxu0 %v2129_v2  ;;  %1909 = vmatprep.subr.bf16.mxu1 %v2218_v35  ;;  %v2201_v35 = vld [vmem:[#allocation10 + $0x1d4] ss:$8 sps:$4 sm:$0xff]  }
 0x25e   :  { %1303 = vmatpush1.bf16.msra.mxu0 %v2127_v3 }
 0x25f   :  { %1304 = vmatprep.subr.bf16.mxu0 %v2132_v4 }
 0x262   :  { %1305 = vmatpush1.bf16.msra.mxu0 %v2130_v5 }
 0x263   :  { %1306 = vmatprep.subr.bf16.mxu0 %v2135_v6 }
 0x266   :  { %1307 = vmatpush1.bf16.msra.mxu0 %v2133_v7 }
 0x267   :  { %1308 = vmatprep.subr.bf16.mxu0 %v2138_v8 }
 0x26a   :  { %1309 = vmatpush1.bf16.msra.mxu0 %v2136_v9 }
 0x26b   :  { %1310 = vmatprep.subr.bf16.mxu0 %v2141_v10  ;;  %v2160_v10 = vld [vmem:[#allocation10 + $0x100] ss:$8 sps:$4 sm:$0xff]  }
 0x26e   :  { %1311 = vmatpush1.bf16.msra.mxu0 %v2139_v11  ;;  %v2165_v11 = vld [vmem:[#allocation10 + $0x114] ss:$8 sps:$4 sm:$0xff]  }
 0x26f   :  { %1312 = vmatprep.subr.bf16.mxu0 %v2144_v12  ;;  %v2163_v12 = vld [vmem:[#allocation10 + $0x110] ss:$8 sps:$4 sm:$0xff]  }
 0x272   :  { %1313 = vmatpush1.bf16.msra.mxu0 %v2142_v13  ;;  %v2168_v13 = vld [vmem:[#allocation10 + $0x124] ss:$8 sps:$4 sm:$0xff]  }
 0x273   :  { %1314 = vmatprep.subr.bf16.mxu0 %v2147_v14  ;;  %v2166_v14 = vld [vmem:[#allocation10 + $0x120] ss:$8 sps:$4 sm:$0xff]  }
 0x276   :  { %1315 = vmatpush1.bf16.msra.mxu0 %v2145_v15  ;;  %v2171_v15 = vld [vmem:[#allocation10 + $0x134] ss:$8 sps:$4 sm:$0xff]  }
 0x277   :  { %1316 = vmatprep.subr.bf16.mxu0 %v2150_v16  ;;  %v2169_v16 = vld [vmem:[#allocation10 + $0x130] ss:$8 sps:$4 sm:$0xff]  }
 0x27a   :  { %1317 = vmatpush1.bf16.msra.mxu0 %v2148_v17  ;;  %v2174_v17 = vld [vmem:[#allocation10 + $0x144] ss:$8 sps:$4 sm:$0xff]  }
 0x27b   :  { %1318 = vmatprep.subr.bf16.mxu0 %v2153_v18  ;;  %v2172_v18 = vld [vmem:[#allocation10 + $0x140] ss:$8 sps:$4 sm:$0xff]  }
 0x27e   :  { %1319 = vmatpush1.bf16.msra.mxu0 %v2151_v19  ;;  %v2177_v19 = vld [vmem:[#allocation10 + $0x154] ss:$8 sps:$4 sm:$0xff]  }
 0x27f   :  { %1320 = vmatprep.subr.bf16.mxu0 %v2156_v20  ;;  %v2175_v20 = vld [vmem:[#allocation10 + $0x150] ss:$8 sps:$4 sm:$0xff]  }
 0x282   :  { %1321 = vmatpush1.bf16.msra.mxu0 %v2154_v21  ;;  %v2180_v21 = vld [vmem:[#allocation10 + $0x164] ss:$8 sps:$4 sm:$0xff]  }
 0x283   :  { %1322 = vmatprep.subr.bf16.mxu0 %v2159_v22  ;;  %v2178_v22 = vld [vmem:[#allocation10 + $0x160] ss:$8 sps:$4 sm:$0xff]  }
 0x286   :  { %1323 = vmatpush1.bf16.msra.mxu0 %v2157_v23  ;;  %v2183_v23 = vld [vmem:[#allocation10 + $0x174] ss:$8 sps:$4 sm:$0xff]  }
 0x287   :  { %1335 = vmatprep.subr.bf16.mxu0 %v2162_v24  ;;  %v2181_v24 = vld [vmem:[#allocation10 + $0x170] ss:$8 sps:$4 sm:$0xff]  }
 0x31c   :  { %v832_v46 = vpop.f32.mrb[0].mxu0  ;;  %v875_v47 = vpop.f32.mrb[8].mxu1 }
 0x31d   :  { %v833_v48 = vadd.f32 %v832_v46, %v461_v42  ;;  %v876_v49 = vadd.f32 %v875_v47, %v469_v43  ;;  %v834_v50 = vpop.f32.mrb[1].mxu0  ;;  %v877_v51 = vpop.f32.mrb[9].mxu1  ;;  %v2221_v46 = vld [vmem:[#allocation11 + $0x30] sm:$0xff]   ;;  %v2222_v47 = vld [vmem:[#allocation11 + $0x78] sm:$0xff]  }
 0x31e   :  { %v835_v52 = vadd.f32 %v834_v50, %v465_v44  ;;  %v878_v53 = vadd.f32 %v877_v51, %v473_v45  ;;  %v836_v54 = vpop.f32.mrb[2].mxu0  ;;  %v879_v55 = vpop.f32.mrb[10].mxu1 }
 0x31f   :  { %v837_v56 = vadd.f32 %v836_v54, %v461_v42  ;;  %v880_v57 = vadd.f32 %v879_v55, %v469_v43  ;;  %v838_v58 = vpop.f32.mrb[3].mxu0  ;;  %v881_v36 = vpop.f32.mrb[11].mxu1  ;;  %v884_v61 = vmax.f32 %v833_v48, 0.0  ;;  %v886_v62 = vmax.f32 %v876_v49, 0.0  ;;  %v2207_v42 = vld [vmem:[#allocation10 + $0x1f4] ss:$8 sps:$4 sm:$0xff]  }
 0x320   :  { %v839_v59 = vadd.f32 %v838_v58, %v465_v44  ;;  %v882_v60 = vadd.f32 %v881_v36, %v473_v45  ;;  %v885_v2 = vmax.f32 %v835_v52, 0.0  ;;  %v887_v3 = vmax.f32 %v878_v53, 0.0  ;;  %v2205_v43 = vld [vmem:[#allocation10 + $0x1f0] ss:$8 sps:$4 sm:$0xff]   ;;  %v2219_v44 = vld [vmem:[#allocation11 + $0x28] sm:$0xff]  }
 0x321   :  { %v888_v63 = vmax.f32 %v837_v56, 0.0  ;;  %v890_v1 = vmax.f32 %v880_v57, 0.0  ;;  %1910 = vmatpush3.bf16.msra.mxu1 %v2219_v44  ;;  %v2220_v45 = vld [vmem:[#allocation11 + $0x70] sm:$0xff]   ;;  %v2223_v48 = vld [vmem:[#allocation11 + $0x38] sm:$0xff]  }
 0x322   :  { %v889_v4 = vmax.f32 %v839_v59, 0.0  ;;  %v891_v5 = vmax.f32 %v882_v60, 0.0  ;;  %1911 = vmatprep.subr.bf16.mxu1 %v2220_v45  ;;  %v960_v49 = vld [vmem:[%s2705_s8] sm:$0x3] }
 0x323   :  { %v892_v6 = vpack.c.bf16 %v888_v63, %v884_v61  ;;  %v2658_v7 = vpack.c.bf16 %v890_v1, %v886_v62  ;;  %v965_v50 = vrot.slane %v960_v49, %v2641_v37  ;;  %v969_v51 = vrot.slane %v960_v49, %v2647_v39  ;;  %v2225_v37 = vld [vmem:[#allocation13 + $0x8] sm:$0xff]   ;;  %v2226_v39 = vld [vmem:[#allocation13 + $0x10] sm:$0xff]  }
 0x324   :  { %v893_v8 = vpack.c.bf16 %v889_v4, %v885_v2  ;;  %v895_v9 = vpack.c.bf16 %v891_v5, %v887_v3  ;;  %v2224_v2 = vld [vmem:[#allocation13] sm:$0xff]   ;;  %v2227_v3 = vld [vmem:[#allocation13 + $0x18] sm:$0xff]   ;;  %v2229_v5 = vld [vmem:[#allocation13 + $0x28] sm:$0xff]  }
 0x325   :  { %1912 = vmatpush3.bf16.msra.mxu1 %v2221_v46  ;;  %v2228_v4 = vld [vmem:[#allocation13 + $0x20] sm:$0xff]  }
 0x326   :  { %1324 = vmatprep.mubr.bf16.mxu0 %v893_v8  ;;  %1913 = vmatprep.subr.bf16.mxu1 %v2222_v47 }
 0x327   :  { %1325 = vmatmul.mubr.bf16.vlgmr.msra.gmra.mrb[4].mxu0 %v892_v6  ;;  %v2230_v6 = vld [vmem:[#allocation13 + $0x30] sm:$0xff]  }
 0x328   :  { %1336 = vmatpush1.bf16.msra.mxu0 %v2160_v10  ;;  %1367 = vmatprep.mubr.bf16.mxu0 %v895_v9  ;;  %v1868_v9 = vld [vmem:[%s2707_s10] ss:$0 sm:$0xff]  ;;  %s2442_s10 = smov [#allocation14]  }
 0x329   :  { %1337 = vmatprep.subr.bf16.mxu0 %v2165_v11  ;;  %1914 = vmatpush3.bf16.msra.mxu1 %v2223_v48 }
 0x32a   :  { %1942 = vmatprep.subr.bf16.mxu1 %v2439_v0 }
 0x32c   :  { %1338 = vmatpush1.bf16.msra.mxu0 %v2163_v12 }
 0x32d   :  { %1339 = vmatprep.subr.bf16.mxu0 %v2168_v13 }
 0x330   :  { %1340 = vmatpush1.bf16.msra.mxu0 %v2166_v14 }
 0x331   :  { %1341 = vmatprep.subr.bf16.mxu0 %v2171_v15 }
 0x334   :  { %1342 = vmatpush1.bf16.msra.mxu0 %v2169_v16 }
 0x335   :  { %1343 = vmatprep.subr.bf16.mxu0 %v2174_v17 }
 0x338   :  { %1344 = vmatpush1.bf16.msra.mxu0 %v2172_v18 }
 0x339   :  { %1345 = vmatprep.subr.bf16.mxu0 %v2177_v19 }
 0x33c   :  { %1346 = vmatpush1.bf16.msra.mxu0 %v2175_v20 }
 0x33d   :  { %1347 = vmatprep.subr.bf16.mxu0 %v2180_v21 }
 0x340   :  { %1348 = vmatpush1.bf16.msra.mxu0 %v2178_v22 }
 0x341   :  { %1349 = vmatprep.subr.bf16.mxu0 %v2183_v23 }
 0x344   :  { %1350 = vmatpush1.bf16.msra.mxu0 %v2181_v24 }
 0x345   :  { %1351 = vmatprep.subr.bf16.mxu0 %v2186_v25 }
 0x348   :  { %1352 = vmatpush1.bf16.msra.mxu0 %v2184_v26 }
 0x349   :  { %1353 = vmatprep.subr.bf16.mxu0 %v2189_v27 }
 0x34c   :  { %1354 = vmatpush1.bf16.msra.mxu0 %v2187_v28 }
 0x34d   :  { %1355 = vmatprep.subr.bf16.mxu0 %v2192_v29 }
 0x350   :  { %1356 = vmatpush1.bf16.msra.mxu0 %v2190_v30 }
 0x351   :  { %1357 = vmatprep.subr.bf16.mxu0 %v2195_v31 }
 0x354   :  { %1358 = vmatpush1.bf16.msra.mxu0 %v2193_v32 }
 0x355   :  { %1359 = vmatprep.subr.bf16.mxu0 %v2198_v33 }
 0x358   :  { %1360 = vmatpush1.bf16.msra.mxu0 %v2196_v34 }
 0x359   :  { %1361 = vmatprep.subr.bf16.mxu0 %v2201_v35 }
 0x35c   :  { %1362 = vmatpush1.bf16.msra.mxu0 %v2199_v38 }
 0x35d   :  { %1363 = vmatprep.subr.bf16.mxu0 %v2204_v40 }
 0x360   :  { %1364 = vmatpush1.bf16.msra.mxu0 %v2202_v41 }
 0x361   :  { %1365 = vmatprep.subr.bf16.mxu0 %v2207_v42 }
 0x364   :  { %1366 = vmatpush1.bf16.msra.mxu0 %v2205_v43 }
 0x367   :  { %1368 = vmatmul.mubr.bf16.vlgmr.msra.gmra.mrb[4].mxu0 %v2658_v7  ;;  %v2231_v7 = vld [vmem:[#allocation13 + $0x38] sm:$0xff]  }
 0x43a   :  { %v1369_v52 = vpop.f32.mrb[4].mxu0 }
 0x43b   :  { %v1962_v53 = vadd.f32 %v1369_v52, %v965_v50  ;;  %v1371_v54 = vpop.f32.mrb[5].mxu0 }
 0x43c   :  { %v1963_v55 = vadd.f32 %v1371_v54, %v969_v51  ;;  %v1373_v56 = vpop.f32.mrb[6].mxu0 }
 0x43d   :  { %v1964_v57 = vadd.f32 %v1373_v56, %v965_v50  ;;  %v1375_v58 = vpop.f32.mrb[7].mxu0  ;;  %v1378_v59 = vmax.f32 %v1962_v53, 0.0 }
 0x43e   :  { %v1965_v36 = vadd.f32 %v1375_v58, %v969_v51  ;;  %v1379_v61 = vmax.f32 %v1963_v55, 0.0 }
 0x43f   :  { %v1380_v60 = vmax.f32 %v1964_v57, 0.0 }
 0x440   :  { %v1381_v62 = vmax.f32 %v1965_v36, 0.0 }
 0x441   :  { %v1382_v63 = vpack.c.bf16 %v1380_v60, %v1378_v59 }
 0x442   :  { %v1383_v1 = vpack.c.bf16 %v1381_v62, %v1379_v61 }
 0x444   :  { %1551 = vmatprep.mubr.bf16.mxu1 %v1383_v1 }
 0x445   :  { %1552 = vmatmul.mubr.bf16.vlgmr.msra.gmra.mrb[12].mxu1 %v1382_v63 }
 0x446   :  { %1943 = vmatpush3.bf16.msra.mxu1 %v2224_v2  ;;  %1958 = vmatprep.mubr.msk.bf16.mxu1 %vm2440_vm0, %v2439_v0 }
 0x447   :  { %1944 = vmatprep.subr.bf16.mxu1 %v2439_v0 }
 0x44a   :  { %1945 = vmatpush3.bf16.msra.mxu1 %v2225_v37 }
 0x44b   :  { %1946 = vmatprep.subr.bf16.mxu1 %v2439_v0 }
 0x44e   :  { %1947 = vmatpush3.bf16.msra.mxu1 %v2226_v39 }
 0x44f   :  { %1948 = vmatprep.subr.bf16.mxu1 %v2439_v0 }
 0x452   :  { %1949 = vmatpush3.bf16.msra.mxu1 %v2227_v3 }
 0x453   :  { %1950 = vmatprep.subr.bf16.mxu1 %v2439_v0 }
 0x456   :  { %1951 = vmatpush3.bf16.msra.mxu1 %v2228_v4 }
 0x457   :  { %1952 = vmatprep.subr.bf16.mxu1 %v2439_v0 }
 0x45a   :  { %1953 = vmatpush3.bf16.msra.mxu1 %v2229_v5 }
 0x45b   :  { %1954 = vmatprep.subr.bf16.mxu1 %v2439_v0 }
 0x45e   :  { %1955 = vmatpush3.bf16.msra.mxu1 %v2230_v6 }
 0x45f   :  { %1956 = vmatprep.subr.bf16.mxu1 %v2439_v0  ;;  %v1885_v0 = vld [vmem:[%s2709_s12] ss:$0 sm:$0xff]  ;;  %s1702_s12 = sshll.u32 %s2442_s10, 4  ;;  %s1703_s12 = int_to_ptr.vmem [resolvable:$true] %s1702_s12 }
 0x460   :  { %s2394_s1 = scalar_lea.vmem %s1703_s12, 256  ;;  %p2399_p1 = scmp.lt.s32.totalorder %s1703_s12, %s1703_s12 }
 0x461   :  { %p2395_p0 = scmp.ne.s32.totalorder %s1703_s12, %s2394_s1  ;;  %p2400_p2 = scmp.lt.s32.totalorder %s2394_s1, %s2394_s1 }
 0x462   :  { %1957 = vmatpush3.bf16.msra.mxu1 %v2231_v7 }
 0x463   :  { %p2401_p3 = por %p2400_p2, %p2399_p1 }
 0x465   :  { %p2402_p4 = pnand %p2401_p3, %p2395_p0 }
 0x518   :  { %v1915_v8 = vpop.f32.mrb[12].mxu1 }
 0x519   :  { %v1916_v10 = vpop.f32.mrb[13].mxu1 }
 0x51a   :  { %v1917_v11 = vadd.f32 %v1916_v10, %v1915_v8  ;;  %v1918_v12 = vpop.f32.mrb[14].mxu1 }
 0x51b   :  { %v1919_v13 = vpop.f32.mrb[15].mxu1 }
 0x51c   :  { %v1554_v14 = vadd.f32 %v1917_v11, %v1868_v9  ;;  %v1920_v15 = vadd.f32 %v1919_v13, %v1918_v12 }
 0x51e   :  { %v1557_v16 = vadd.f32 %v1920_v15, %v1868_v9  ;;  %v1560_v17 = vmax.f32 %v1554_v14, 0.0 }
 0x520   :  { %v1561_v18 = vmax.f32 %v1557_v16, 0.0 }
 0x522   :  { %v1562_v19 = vpack.c.bf16 %v1561_v18, %v1560_v17 }
 0x524   :  { %1959 = vmatmul.mubr.bf16.vlgmr.msra.gmra.mrb[16].mxu1 %v1562_v19 }
 0x5f7   :  { %v1668_v20 = vpop.f32.mrb[16].mxu1 }
 0x5f8   :  { %v1669_v21 = vadd.f32 %v1885_v0, %v1668_v20  ;;  %v1960_v22 = vpop.f32.mrb[17].mxu1 }
 0x5f9   :  { %v1671_v23 = vpop.f32.mrb[18].mxu1 }
 0x5fa   :  { %1675 = vmax.xlane.f32.xlu0 %v1669_v21  ;;  %v1961_v24 = vpop.f32.mrb[19].mxu1  ;;  %v1672_v25 = vadd.f32 %v1885_v0, %v1671_v23 }
 0x5fe   :  { %1677 = vmax.xlane.f32.xlu0 %v1672_v25 }
 0x687   :  { %v1676_v26 = vpop.xlane.xlu0 %1675 }
 0x688   :  { %v1679_v27 = vsub.f32 %v1669_v21, %v1676_v26 }
 0x68a   :  { %v1681_v28 = vmul.f32 1.442695, %v1679_v27 }
 0x68b   :  { %v1678_v29 = vpop.xlane.xlu0 %1677 }
 0x68c   :  { %v1680_v30 = vsub.f32 %v1672_v25, %v1678_v29  ;;  %2232 = vpow2.f32 %v1681_v28 }
 0x68e   :  { %v1683_v31 = vmul.f32 1.442695, %v1680_v30 }
 0x690   :  { %2234 = vpow2.f32 %v1683_v31 }
 0x696   :  { %v2233_v32 = vpop.eup %2232 }
 0x697   :  { %1685 = vadd.xlane.f32.xlu1 %v2233_v32 }
 0x69a   :  { %v2235_v33 = vpop.eup %2234 }
 0x69b   :  { %1687 = vadd.xlane.f32.xlu1 %v2235_v33 }
 0x724   :  { %v1686_v34 = vpop.xlane.xlu1 %1685 }
 0x725   :  { %2236 = vlog2.f32 %v1686_v34 }
 0x728   :  { %v1688_v35 = vpop.xlane.xlu1 %1687 }
 0x729   :  { %2238 = vlog2.f32 %v1688_v35 }
 0x72f   :  { %v2237_v38 = vpop.eup %2236 }
 0x730   :  { %v1690_v40 = vmul.f32 0.6931472, %v2237_v38 }
 0x732   :  { %v1693_v41 = vsub.f32 %v1679_v27, %v1690_v40 }
 0x733   :  { %v2239_v42 = vpop.eup %2238 }
 0x734   :  { %1695 = vst [vmem:[#allocation14] sm:$0xff] %v1693_v41  ;;  %v1692_v43 = vmul.f32 0.6931472, %v2239_v42 }
 0x736   :  { %v1694_v44 = vsub.f32 %v1680_v30, %v1692_v43 }
 0x738   :  { %1696 = vst [vmem:[#allocation14 + $0x8] sm:$0xff] %v1694_v44 }
 0x739   :  { %2405 = shalt.err (!%p2402_p4)
}
 0x73a   :  { %s2406_s26 = scalar_lea.hbm %s2710_s13, 256 }
 0x73b   :  { %p2407_p5 = scmp.ne.s32.totalorder %s2710_s13, %s2406_s26  ;;  %p2410_p6 = scmp.lt.u32.totalorder %s2406_s26, %s2710_s13 }
 0x73d   :  { %p2412_p7 = pnand %p2410_p6, %p2407_p5 }
 0x73f   :  { %2415 = shalt.err (!%p2412_p7)
}
 0x740   :  { %1708 = dma.vmem_to_hbm [thread:$0]  %s1703_s12, 256, %s2710_s13, [#allocation4], %s2435_s0, %s2435_s0, %s2436_s24  }
 0x741   :  { %2424 = dma.done.wait [#allocation4], 256  }
 0x742   :  { %2425 = vsyncadd [#allocation4], 4294967040 }
 0x743   :  { %1712 = vsyncpa [#allocation3], 1 }
 0x744   :  { %1713 = vsyncpa [#allocation6], 1 }
 0x745   :  { %1714 = vsyncpa [#allocation9], 1 }
 0x746   :  { %1715 = vsyncpa [#allocation12], 1 }
 0x747   :  { %1716 = vsyncpa [#allocation4], 1 }

</bundles_post_ra>
